<compile_context>
chip_gen: v6e
topology: v6e:2x2x1
jax: 0.10.0
libtpu: 0.0.40
codegen_flags: <defaults>
</compile_context>

<pallas_src>
import jax
import jax.numpy as jnp
from jax.experimental import pallas as pl
from jax.experimental.pallas import tpu as pltpu

NCL = 5
NFEATURES = 16 * 16
NHIDDEN = 8 * 8
LANE = 128       # lane-dense padded class dimension
MAX_TB = 1024    # batch-tile rows: 1 MiB/x buffer, fits all TPU generations


def _round_up(n, m):
    return ((n + m - 1) // m) * m


def leenet_kernel(x_ref, w1_ref, b1_ref, w2_ref, b2_ref, out_ref):
    # x_ref : (TB, 256)            w1_ref: (256, 64) bf16   b1_ref: (1, 64) f32
    # w2_ref: (64, 128) f32 (cols >= NCL are 0)   b2_ref: (1, 128) f32 (same)
    # out_ref: (TB, 128) f32 (lanes >= NCL are 0)

    # fc1 + relu: bf16 MXU operands, f32 accumulation.
    x_bf = x_ref[...].astype(jnp.bfloat16)
    h = jnp.dot(x_bf, w1_ref[...], preferred_element_type=jnp.float32)
    h = jnp.maximum(h + b1_ref[...], 0.0)

    # fc2 + relu at lane-dense width 128; padded columns are exactly 0.
    z = jnp.dot(h, w2_ref[...], preferred_element_type=jnp.float32) + b2_ref[...]
    z = jnp.maximum(z, 0.0)

    lane = jax.lax.broadcasted_iota(jnp.int32, z.shape, 1)
    valid = lane < NCL
    inv_n = 1.0 / NCL

    # layer_norm over the NCL real classes.  eps=1e-50 underflows to 0 in f32,
    # so it is dropped (rows with var==0 give NaN in both kernel and reference,
    # preserving PyTorch-under-f32 parity).
    mean = jnp.sum(z, axis=-1, keepdims=True) * inv_n      # padded lanes add 0
    d = jnp.where(valid, z - mean, 0.0)
    var = jnp.sum(d * d, axis=-1, keepdims=True) * inv_n
    zn = d * jax.lax.rsqrt(var)

    # softmax over the class dim; |zn| <= 2 after layer_norm -> no max-shift.
    e = jnp.where(valid, jnp.exp(zn), 0.0)
    denom = jnp.sum(e, axis=-1, keepdims=True)
    out_ref[...] = e * pl.reciprocal(denom, approx=True)


def leenet_forward(x, w1, b1, w2, b2, *, max_tb=MAX_TB):
    """x: (B, C, H, W) or (B, F). Returns softmax probs (B, NCL) in f32."""
    nbatch = x.shape[0]
    x2d = x.reshape(nbatch, -1)      # == x.view(nBatch, -1); no extra HBM cast pass
    assert x2d.shape[1] == NFEATURES

    w1_bf = w1.astype(jnp.bfloat16)
    b1_2d = b1.reshape(1, NHIDDEN).astype(jnp.float32)
    # Zero-pad the class dim to LANE so stores / writeback are lane-dense.
    w2_pad = jnp.zeros((NHIDDEN, LANE), jnp.float32).at[:, :NCL].set(
        w2.astype(jnp.float32))
    b2_pad = jnp.zeros((1, LANE), jnp.float32).at[:, :NCL].set(
        b2.reshape(NCL).astype(jnp.float32))

    tb = min(max_tb, _round_up(nbatch, 8))
    grid = (pl.cdiv(nbatch, tb),)

    out_padded = pl.pallas_call(
        leenet_kernel,
        out_shape=jax.ShapeDtypeStruct((nbatch, LANE), jnp.float32),
        grid=grid,
        in_specs=[
            pl.BlockSpec((tb, NFEATURES), lambda i: (i, 0)),       # x: tiled over batch
            pl.BlockSpec((NFEATURES, NHIDDEN), lambda i: (0, 0)),  # w1: resident
            pl.BlockSpec((1, NHIDDEN), lambda i: (0, 0)),          # b1: resident
            pl.BlockSpec((NHIDDEN, LANE), lambda i: (0, 0)),       # w2 (padded): resident
            pl.BlockSpec((1, LANE), lambda i: (0, 0)),             # b2 (padded): resident
        ],
        out_specs=pl.BlockSpec((tb, LANE), lambda i: (i, 0)),
        compiler_params=pltpu.CompilerParams(
            dimension_semantics=("parallel",),   # shard batch tiles across TCs on v7x
            vmem_limit_bytes=32 * 1024 * 1024,
        ),
    )(x2d, w1_bf, b1_2d, w2_pad, b2_pad)

    return out_padded[:, :NCL]


def reference_forward(x, w1, b1, w2, b2):
    nbatch = x.shape[0]
    x2d = x.reshape(nbatch, -1).astype(jnp.float32)
    h = jnp.maximum(x2d @ w1 + b1, 0.0)
    z = jnp.maximum(h @ w2 + b2, 0.0)
    mean = jnp.mean(z, axis=-1, keepdims=True)
    var = jnp.mean((z - mean) ** 2, axis=-1, keepdims=True)
    zn = (z - mean) / jnp.sqrt(var + 1e-50)
    return jax.nn.softmax(zn, axis=-1)


if __name__ == "__main__":
    key = jax.random.PRNGKey(0)
    kx, k1, k2, k3, k4 = jax.random.split(key, 5)

    # Deterministic synthetic parameters (PyTorch Linear shapes, stored (in, out)).
    batch = 2
    x = jax.random.normal(kx, (batch, 1, 16, 16), dtype=jnp.float32)  # NCHW-style
    w1 = jax.random.normal(k1, (NFEATURES, NHIDDEN), dtype=jnp.float32) * 0.05
    b1 = jax.random.normal(k2, (NHIDDEN,), dtype=jnp.float32) * 0.05
    w2 = jax.random.normal(k3, (NHIDDEN, NCL), dtype=jnp.float32) * 0.05
    b2 = jax.random.normal(k4, (NCL,), dtype=jnp.float32) * 0.05

    probs = leenet_forward(x, w1, b1, w2, b2)
    jax.block_until_ready(probs)

    ref = reference_forward(x, w1, b1, w2, b2)
    assert probs.shape == (batch, NCL)
    # fc1 runs with bf16 MXU operands -> compare against the f32 reference at a
    # correspondingly relaxed tolerance (per perf review).
    assert jnp.allclose(probs, ref, atol=2e-2, rtol=2e-2)
    # approx reciprocal on the EUP: rows sum to 1 within approx-rcp accuracy.
    assert jnp.allclose(jnp.sum(probs, axis=-1), 1.0, atol=5e-3)

    print("KERNEL_OK")
</pallas_src>

<mosaic_0001>
module attributes {stable_mosaic.version = 11 : i64} {
  func.func @leenet_kernel(%arg0: i32, %arg1: memref<8x256xf32, #tpu.memory_space<vmem>>, %arg2: memref<256x64xbf16, #tpu.memory_space<vmem>>, %arg3: memref<1x64xf32, #tpu.memory_space<vmem>>, %arg4: memref<64x128xf32, #tpu.memory_space<vmem>>, %arg5: memref<1x128xf32, #tpu.memory_space<vmem>>, %arg6: memref<8x128xf32, #tpu.memory_space<vmem>>) attributes {dimension_semantics = [#tpu.dimension_semantics<parallel>], iteration_bounds = array<i64: 1>, scalar_prefetch = 0 : i64, scratch_operands = 0 : i64, tpu.core_type = #tpu.core_type<tc>, window_params = [{transform_indices = @transform_0, window_bounds = array<i64: 8, 256>}, {pipeline_mode = #tpu.pipeline_mode<synchronous>, transform_indices = @transform_1, window_bounds = array<i64: 256, 64>}, {pipeline_mode = #tpu.pipeline_mode<synchronous>, transform_indices = @transform_2, window_bounds = array<i64: 1, 64>}, {pipeline_mode = #tpu.pipeline_mode<synchronous>, transform_indices = @transform_3, window_bounds = array<i64: 64, 128>}, {pipeline_mode = #tpu.pipeline_mode<synchronous>, transform_indices = @transform_4, window_bounds = array<i64: 1, 128>}, {transform_indices = @transform_5, window_bounds = array<i64: 8, 128>}]} {
    %c0 = arith.constant 0 : index
    %c0_0 = arith.constant 0 : index
    %0 = vector.load %arg1[%c0, %c0_0] : memref<8x256xf32, #tpu.memory_space<vmem>>, vector<8x256xf32>
    %1 = arith.truncf %0 : vector<8x256xf32> to vector<8x256xbf16>
    %c0_1 = arith.constant 0 : index
    %c0_2 = arith.constant 0 : index
    %2 = vector.load %arg2[%c0_1, %c0_2] : memref<256x64xbf16, #tpu.memory_space<vmem>>, vector<256x64xbf16>
    %cst = arith.constant dense<0.000000e+00> : vector<8x64xf32>
    %3 = tpu.matmul %1, %2, %cst {dimension_numbers = #tpu.dot_dimension_numbers<[1], [0], [0], [1], [0, 0, 1, 1], [], []>} : vector<8x256xbf16>, vector<256x64xbf16>, vector<8x64xf32> -> vector<8x64xf32>
    %c0_3 = arith.constant 0 : index
    %c0_4 = arith.constant 0 : index
    %4 = vector.load %arg3[%c0_3, %c0_4] : memref<1x64xf32, #tpu.memory_space<vmem>>, vector<1x64xf32>
    %5 = vector.broadcast %4 : vector<1x64xf32> to vector<8x64xf32>
    %6 = arith.addf %3, %5 : vector<8x64xf32>
    %cst_5 = arith.constant 0.000000e+00 : f32
    %7 = vector.broadcast %cst_5 : f32 to vector<8x64xf32>
    %8 = arith.maximumf %6, %7 : vector<8x64xf32>
    %c0_6 = arith.constant 0 : index
    %c0_7 = arith.constant 0 : index
    %9 = vector.load %arg4[%c0_6, %c0_7] : memref<64x128xf32, #tpu.memory_space<vmem>>, vector<64x128xf32>
    %cst_8 = arith.constant dense<0.000000e+00> : vector<8x128xf32>
    %10 = tpu.matmul %8, %9, %cst_8 {dimension_numbers = #tpu.dot_dimension_numbers<[1], [0], [0], [1], [0, 0, 1, 1], [], []>} : vector<8x64xf32>, vector<64x128xf32>, vector<8x128xf32> -> vector<8x128xf32>
    %c0_9 = arith.constant 0 : index
    %c0_10 = arith.constant 0 : index
    %11 = vector.load %arg5[%c0_9, %c0_10] : memref<1x128xf32, #tpu.memory_space<vmem>>, vector<1x128xf32>
    %12 = vector.broadcast %11 : vector<1x128xf32> to vector<8x128xf32>
    %13 = arith.addf %10, %12 : vector<8x128xf32>
    %cst_11 = arith.constant 0.000000e+00 : f32
    %14 = vector.broadcast %cst_11 : f32 to vector<8x128xf32>
    %15 = arith.maximumf %13, %14 : vector<8x128xf32>
    %16 = tpu.iota {dimensions = array<i32: 1>} : vector<8x128xi32>
    %c5_i32 = arith.constant 5 : i32
    %17 = vector.broadcast %c5_i32 : i32 to vector<8x128xi32>
    %18 = arith.cmpi slt, %16, %17 : vector<8x128xi32>
    %cst_12 = arith.constant dense<0.000000e+00> : vector<8xf32>
    %19 = vector.multi_reduction <add>, %15, %cst_12 [1] : vector<8x128xf32> to vector<8xf32>
    %20 = vector.shape_cast %19 : vector<8xf32> to vector<8x1xf32>
    %cst_13 = arith.constant 2.000000e-01 : f32
    %21 = vector.broadcast %cst_13 : f32 to vector<8x1xf32>
    %22 = arith.mulf %20, %21 : vector<8x1xf32>
    %23 = vector.broadcast %22 : vector<8x1xf32> to vector<8x128xf32>
    %24 = arith.subf %15, %23 : vector<8x128xf32>
    %cst_14 = arith.constant 0.000000e+00 : f32
    %25 = vector.broadcast %cst_14 : f32 to vector<8x128xf32>
    %26 = arith.select %18, %24, %25 : vector<8x128xi1>, vector<8x128xf32>
    %27 = arith.mulf %26, %26 : vector<8x128xf32>
    %cst_15 = arith.constant dense<0.000000e+00> : vector<8xf32>
    %28 = vector.multi_reduction <add>, %27, %cst_15 [1] : vector<8x128xf32> to vector<8xf32>
    %29 = vector.shape_cast %28 : vector<8xf32> to vector<8x1xf32>
    %cst_16 = arith.constant 2.000000e-01 : f32
    %30 = vector.broadcast %cst_16 : f32 to vector<8x1xf32>
    %31 = arith.mulf %29, %30 : vector<8x1xf32>
    %32 = math.rsqrt %31 : vector<8x1xf32>
    %33 = vector.broadcast %32 : vector<8x1xf32> to vector<8x128xf32>
    %34 = arith.mulf %26, %33 : vector<8x128xf32>
    %35 = math.exp %34 : vector<8x128xf32>
    %cst_17 = arith.constant 0.000000e+00 : f32
    %36 = vector.broadcast %cst_17 : f32 to vector<8x128xf32>
    %37 = arith.select %18, %35, %36 : vector<8x128xi1>, vector<8x128xf32>
    %cst_18 = arith.constant dense<0.000000e+00> : vector<8xf32>
    %38 = vector.multi_reduction <add>, %37, %cst_18 [1] : vector<8x128xf32> to vector<8xf32>
    %39 = vector.shape_cast %38 : vector<8xf32> to vector<8x1xf32>
    %40 = tpu.reciprocal %39 {approx = true} : vector<8x1xf32> -> vector<8x1xf32>
    %41 = vector.broadcast %40 : vector<8x1xf32> to vector<8x128xf32>
    %42 = arith.mulf %37, %41 : vector<8x128xf32>
    %c0_19 = arith.constant 0 : index
    %c0_20 = arith.constant 0 : index
    %43 = vector.load %arg6[%c0_19, %c0_20] : memref<8x128xf32, #tpu.memory_space<vmem>>, vector<8x128xf32>
    tpu.vector_store %arg6[%c0_19, %c0_20], %42 {strides = array<i32>} : memref<8x128xf32, #tpu.memory_space<vmem>>, vector<8x128xf32>,
    return
  }
  func.func @transform_0(%arg0: i32) -> (i32, i32) {
    %c0_i32 = arith.constant 0 : i32
    %c0_i32_0 = arith.constant 0 : i32
    return %arg0, %c0_i32 : i32, i32
  }
  func.func @transform_1(%arg0: i32) -> (i32, i32) {
    %c0_i32 = arith.constant 0 : i32
    %c0_i32_0 = arith.constant 0 : i32
    %c0_i32_1 = arith.constant 0 : i32
    return %c0_i32, %c0_i32_0 : i32, i32
  }
  func.func @transform_2(%arg0: i32) -> (i32, i32) {
    %c0_i32 = arith.constant 0 : i32
    %c0_i32_0 = arith.constant 0 : i32
    %c0_i32_1 = arith.constant 0 : i32
    return %c0_i32, %c0_i32_0 : i32, i32
  }
  func.func @transform_3(%arg0: i32) -> (i32, i32) {
    %c0_i32 = arith.constant 0 : i32
    %c0_i32_0 = arith.constant 0 : i32
    %c0_i32_1 = arith.constant 0 : i32
    return %c0_i32, %c0_i32_0 : i32, i32
  }
  func.func @transform_4(%arg0: i32) -> (i32, i32) {
    %c0_i32 = arith.constant 0 : i32
    %c0_i32_0 = arith.constant 0 : i32
    %c0_i32_1 = arith.constant 0 : i32
    return %c0_i32, %c0_i32_0 : i32, i32
  }
  func.func @transform_5(%arg0: i32) -> (i32, i32) {
    %c0_i32 = arith.constant 0 : i32
    %c0_i32_0 = arith.constant 0 : i32
    return %arg0, %c0_i32 : i32, i32
  }
}

</mosaic_0001>

<bundles_post_ra>
// kernel: tpu_custom_call.1
= control target key start
LH: loop header
LB: loop body
LE: loop exit
PB: predicated region body
PF: predicated region fallthrough
CT: control target
= control target key end

     0   :  { %10 = vsyncpa [#allocation3], 0  ;;  %v479_v2 = vmov 0.0   ;;  %v35_v10 = vlaneseq  ;;  %vm480_vm0 = vmmov 0   ;;  %vm243_vm1 = vcmask 523264   ;;  %s611_s0 = inlined_call_operand.vmem [shape: f32[2,256], index: 0, kind: input, shape index: {}]   ;;  %s612_s1 = inlined_call_operand.vmem [shape: bf16[256,64], index: 1, kind: input, shape index: {}]   ;;  %s613_s2 = inlined_call_operand.vmem [shape: f32[1,64], index: 2, kind: input, shape index: {}]   ;;  %s614_s3 = inlined_call_operand.vmem [shape: f32[64,128], index: 3, kind: input, shape index: {}]   ;;  %s615_s4 = inlined_call_operand.vmem [shape: f32[1,128], index: 4, kind: input, shape index: {}]   ;;  %s616_s5 = inlined_call_operand.hbm [shape: f32[2,128], index: 5, kind: output, shape index: {}]  }
   0x1   :  { %v431_v0 = vld [vmem:[%s612_s1 + $0x78] sm:$0xff]   ;;  %406 = vmatprep.subr.mxu1 %v479_v2  ;;  %v433_v3 = vld [vmem:[%s612_s1 + $0x70] sm:$0xff]   ;;  %v435_v5 = vld [vmem:[%s612_s1 + $0x68] sm:$0xff]   ;;  %422 = vmatprep.mubr.msk.f32.mxu1 %vm480_vm0, %v479_v2 }
   0x2   :  { %v432_v1 = vld [vmem:[%s612_s1 + $0x38] sm:$0xff]   ;;  %375 = vmatprep.subr.bf16.mxu0 %v431_v0  ;;  %v434_v4 = vld [vmem:[%s612_s1 + $0x30] sm:$0xff]   ;;  %v436_v6 = vld [vmem:[%s612_s1 + $0x28] sm:$0xff]   ;;  %v319_v45 = vand.u32 127, %v35_v10 }
   0x3   :  { %376 = vmatpush3.bf16.msra.mxu0 %v432_v1  ;;  %v437_v7 = vld [vmem:[%s612_s1 + $0x60] sm:$0xff]   ;;  %v439_v9 = vld [vmem:[%s612_s1 + $0x58] sm:$0xff]   ;;  %v441_v12 = vld [vmem:[%s612_s1 + $0x50] sm:$0xff]  }
   0x4   :  { %377 = vmatprep.subr.bf16.mxu0 %v433_v3  ;;  %v438_v8 = vld [vmem:[%s612_s1 + $0x20] sm:$0xff]   ;;  %v440_v11 = vld [vmem:[%s612_s1 + $0x18] sm:$0xff]   ;;  %v234_v14 = vld [vmem:[%s614_s3 + $0x30] sm:$0xff]  ;;  %vm320_vm2 = vcmp.lt.s32.totalorder %v319_v45, 5 }
   0x5   :  { %v235_v13 = vld [vmem:[%s614_s3 + $0x38] sm:$0xff]  ;;  %v442_v15 = vld [vmem:[%s612_s1 + $0x10] sm:$0xff]   ;;  %v233_v16 = vld [vmem:[%s614_s3 + $0x28] sm:$0xff] }
   0x6   :  { %407 = vmatpush3.msra.mxu1 %v235_v13  ;;  %v443_v17 = vld [vmem:[%s612_s1 + $0x48] sm:$0xff]   ;;  %v455_v18 = vld.sshfl [vmem:[%s611_s0] sm:$0xff pattern:$0x76325410]  ;;  %v231_v28 = vld [vmem:[%s614_s3 + $0x18] sm:$0xff] }
   0x7   :  { %378 = vmatpush3.bf16.msra.mxu0 %v434_v4  ;;  %408 = vmatprep.subr.mxu1 %v479_v2  ;;  %v456_v19 = vld.sshfl [vmem:[%s611_s0 + $0x8] sm:$0xff pattern:$0x76325410]  ;;  %v445_v21 = vld [vmem:[%s612_s1 + $0x40] sm:$0xff]   ;;  %v230_v29 = vld [vmem:[%s614_s3 + $0x10] sm:$0xff] }
   0x8   :  { %379 = vmatprep.subr.bf16.mxu0 %v435_v5  ;;  %409 = vmatpush3.msra.mxu1 %v234_v14  ;;  %v444_v20 = vld [vmem:[%s612_s1 + $0x8] sm:$0xff]   ;;  %v47_v22 = vcombine.high %v455_v18, %v456_v19  ;;  %v46_v23 = vcombine.low %v455_v18, %v456_v19  ;;  %v446_v24 = vld [vmem:[%s612_s1] sm:$0xff]  }
   0x9   :  { %410 = vmatprep.subr.mxu1 %v479_v2  ;;  %v232_v27 = vld [vmem:[%s614_s3 + $0x20] sm:$0xff]  ;;  %v229_v30 = vld [vmem:[%s614_s3 + $0x8] sm:$0xff] }
   0xa   :  { %411 = vmatpush3.msra.mxu1 %v233_v16  ;;  %v51_v25 = vpack.c.bf16 %v47_v22, %v47_v22  ;;  %v50_v26 = vpack.c.bf16 %v46_v23, %v46_v23  ;;  %v228_v31 = vld [vmem:[%s614_s3] sm:$0xff] }
   0xb   :  { %380 = vmatpush3.bf16.msra.mxu0 %v436_v6  ;;  %412 = vmatprep.subr.mxu1 %v479_v2  ;;  %v356_v33 = vld [vmem:[%s613_s2] ss:$0 sm:$0xff] }
   0xc   :  { %381 = vmatprep.subr.bf16.mxu0 %v437_v7  ;;  %219 = vmatprep.mubr.bf16.mxu0 %v51_v25  ;;  %v373_v40 = vld [vmem:[%s615_s4] ss:$0 sm:$0xff] }
   0xd   :  { %413 = vmatpush3.msra.mxu1 %v232_v27 }
   0xe   :  { %414 = vmatprep.subr.mxu1 %v479_v2 }
   0xf   :  { %382 = vmatpush3.bf16.msra.mxu0 %v438_v8  ;;  %415 = vmatpush3.msra.mxu1 %v231_v28 }
  0x10   :  { %383 = vmatprep.subr.bf16.mxu0 %v439_v9  ;;  %416 = vmatprep.subr.mxu1 %v479_v2 }
  0x11   :  { %417 = vmatpush3.msra.mxu1 %v230_v29 }
  0x12   :  { %418 = vmatprep.subr.mxu1 %v479_v2 }
  0x13   :  { %384 = vmatpush3.bf16.msra.mxu0 %v440_v11  ;;  %419 = vmatpush3.msra.mxu1 %v229_v30 }
  0x14   :  { %385 = vmatprep.subr.bf16.mxu0 %v441_v12  ;;  %420 = vmatprep.subr.mxu1 %v479_v2 }
  0x15   :  { %421 = vmatpush3.msra.mxu1 %v228_v31 }
  0x17   :  { %386 = vmatpush3.bf16.msra.mxu0 %v442_v15 }
  0x18   :  { %387 = vmatprep.subr.bf16.mxu0 %v443_v17 }
  0x1b   :  { %388 = vmatpush3.bf16.msra.mxu0 %v444_v20 }
  0x1c   :  { %389 = vmatprep.subr.bf16.mxu0 %v445_v21 }
  0x1f   :  { %390 = vmatpush3.bf16.msra.mxu0 %v446_v24 }
  0x22   :  { %220 = vmatmul.mubr.bf16.vlgmr.msra.gmra.mxu0 %v50_v26 }
  0xe2   :  { %v391_v32 = vpop.f32.mrf.mxu0 }
  0xe4   :  { %v392_v34 = vpop.f32.mrf.mxu0 }
  0xe5   :  { %v393_v35 = vadd.f32 %v392_v34, %v391_v32 }
  0xe6   :  { %v394_v36 = vpop.f32.mrf.mxu0 }
  0xe7   :  { %v222_v37 = vadd.f32 %v393_v35, %v356_v33 }
  0xe8   :  { %v395_v38 = vpop.f32.mrf.mxu0 }
  0xe9   :  { %v227_v39 = vmax.f32 %v222_v37, 0.0 }
  0xeb   :  { %423 = vmatmul.mubr.msk.f32.vlgmr.msra.gmra.mxu1 %vm243_vm1, %v227_v39 }
 0x1ab   :  { %v313_v41 = vpop.f32.mrf.mxu1 }
 0x1ac   :  { %v314_v42 = vadd.f32 %v373_v40, %v313_v41 }
 0x1ad   :  { %v424_v43 = vpop.f32.mrf.mxu1 }
 0x1ae   :  { %v317_v44 = vmax.f32 %v314_v42, 0.0 }
 0x1b0   :  { %321 = vadd.xlane.f32.xlu0 %v317_v44 }
 0x239   :  { %v322_v46 = vpop.xlane.xlu0 %321 }
 0x23a   :  { %v323_v47 = vmul.f32 0.2, %v322_v46 }
 0x23c   :  { %v324_v48 = vsub.f32 %v317_v44, %v323_v47 }
 0x23e   :  { %v325_v49 = vsel %vm320_vm2, %v324_v48, 0.0 }
 0x23f   :  { %v326_v50 = vmul.f32 %v325_v49, %v325_v49 }
 0x241   :  { %327 = vadd.xlane.f32.xlu0 %v326_v50 }
 0x2ca   :  { %v328_v51 = vpop.xlane.xlu0 %327 }
 0x2cb   :  { %v329_v52 = vmul.f32 0.2, %v328_v51 }
 0x2cd   :  { %449 = vrsqrt.f32 %v329_v52 }
 0x2da   :  { %v450_v53 = vpop.eup %449 }
 0x2db   :  { %v331_v54 = vmul.f32 %v450_v53, %v325_v49 }
 0x2dd   :  { %v332_v55 = vmul.f32 1.442695, %v331_v54 }
 0x2df   :  { %451 = vpow2.f32 %v332_v55 }
 0x2ec   :  { %v452_v56 = vpop.eup %451 }
 0x2ed   :  { %v334_v57 = vsel %vm320_vm2, %v452_v56, 0.0 }
 0x2ee   :  { %335 = vadd.xlane.f32.xlu1 %v334_v57 }
 0x377   :  { %v336_v58 = vpop.xlane.xlu1 %335 }
 0x378   :  { %453 = vrcp.f32 %v336_v58 }
 0x385   :  { %v454_v59 = vpop.eup %453 }
 0x386   :  { %v338_v60 = vmul.f32 %v454_v59, %v334_v57 }
 0x388   :  { %339 = vst [vmem:[#allocation2] sm:$0xff] %v338_v60 }
 0x389   :  { %344 = vsyncadd [#allocation3], 96  ;;  %s481_s2 = smov [#allocation2]  }
 0x38a   :  { %s345_s3 = sshll.u32 %s481_s2, 4  ;;  %s346_s3 = int_to_ptr.vmem [resolvable:$true] %s345_s3 }
 0x38b   :  { %s457_s4 = scalar_lea.vmem %s346_s3, 32  ;;  %s461_s22 = scalar_lea.vmem %s346_s3, 128 }
 0x38c   :  { %p458_p0 = scmp.ne.s32.totalorder %s346_s3, %s457_s4  ;;  %p462_p1 = scmp.lt.s32.totalorder %s346_s3, %s346_s3 }
 0x38d   :  { %p463_p2 = scmp.lt.s32.totalorder %s461_s22, %s457_s4 }
 0x38f   :  { %p464_p3 = por %p463_p2, %p462_p1 }
 0x391   :  { %p465_p4 = pnand %p464_p3, %p458_p0 }
 0x393   :  { %468 = shalt.err (!%p465_p4)
}
 0x394   :  { %s482_s23 = smov 32   ;;  %s483_s24 = smov 2  }
 0x395   :  { %351 = dma.vmem_to_hbm [thread:$0]  %s346_s3, 32, %s616_s5, [#allocation3], %s482_s23, %s482_s23, %s483_s24  }
 0x396   :  { %477 = dma.done.wait [#allocation3], 128  }
 0x397   :  { %478 = vsyncadd [#allocation3], 4294967168 }
 0x398   :  { %355 = vsyncpa [#allocation3], 1 }

</bundles_post_ra>
